<compile_context>
chip_gen: v7x
topology: tpu7x:2x2x1
jax: 0.10.0
libtpu: 0.0.40
codegen_flags: <defaults>
</compile_context>

<pallas_src>
import functools

import jax
import jax.numpy as jnp
from jax.experimental import pallas as pl
from jax.experimental.pallas import tpu as pltpu

_NEG_INF = -1e30


def _wsddn_kernel(x_ref, w_ref, b_ref, scores_ref, *,
                  images_per_block: int, rows_per_image: int,
                  valid_rows: int, kp: int):
    """One grid step == `images_per_block` images (G*Rp proposal rows)."""
    g, rp = images_per_block, rows_per_image

    # Cast x to bf16 in-vreg right before the dot (no wrapper-side HBM round
    # trip). Single fused matmul for both heads, f32 accumulation on the MXU.
    x = x_ref[...]
    if x_ref.dtype != jnp.bfloat16:
        x = x.astype(jnp.bfloat16)
    logits = jnp.dot(x, w_ref[...],
                     preferred_element_type=jnp.float32) + b_ref[...]

    # Split rows per image; Rp is always a sublane multiple (or G == 1).
    logits = logits.reshape(g, rp, 2 * kp)
    cls_logits = logits[..., :kp]      # lane-aligned static slices (128-wide)
    det_logits = logits[..., kp:]

    # Classification stream: softmax over classes (last axis).
    # Padded class lanes carry a -1e30 bias -> exp underflows to exactly 0.
    cls_max = jnp.max(cls_logits, axis=2, keepdims=True)
    cls_exp = jnp.exp(cls_logits - cls_max)
    cls_prob = cls_exp * pl.reciprocal(
        jnp.sum(cls_exp, axis=2, keepdims=True), approx=True)

    # Detection stream: softmax over proposals within each image (axis=1).
    # Zero-padded proposal rows (ragged R) are pushed to -1e30 so they neither
    # set the max nor contribute to the denominator.
    if valid_rows < rp:
        row_ids = jax.lax.broadcasted_iota(jnp.int32, (g, rp, kp), 1)
        det_logits = jnp.where(row_ids < valid_rows, det_logits, _NEG_INF)
    det_max = jnp.max(det_logits, axis=1, keepdims=True)
    det_exp = jnp.exp(det_logits - det_max)
    det_prob = det_exp * pl.reciprocal(
        jnp.sum(det_exp, axis=1, keepdims=True), approx=True)

    scores_ref[...] = (cls_prob * det_prob).reshape(g * rp, kp).astype(
        scores_ref.dtype)


def _vmem_capacity_bytes() -> int:
    """Physical per-core VMEM; conservative v7x default if the query fails."""
    try:
        info = pltpu.get_tpu_info()
        for attr in ("vmem_capacity_bytes", "vmem_size_bytes", "vmem_bytes"):
            cap = getattr(info, attr, None)
            if cap:
                return int(cap)
    except Exception:
        pass
    return 64 << 20


def _pick_images_per_block(num_images: int, footprint_fn, budget_bytes: int) -> int:
    """Largest image group fitting the budget, preferring >=4 grid steps
    (>=2 per v7x TensorCore) so megacore sharding keeps pipeline overlap."""
    divisors = [g for g in range(1, num_images + 1) if num_images % g == 0]
    fitting = [g for g in divisors if footprint_fn(g) <= budget_bytes]
    if not fitting:
        return 1
    for min_steps in (4, 2, 1):
        ok = [g for g in fitting if num_images // g >= min_steps]
        if ok:
            return max(ok)
    return 1


@functools.partial(
    jax.jit,
    static_argnames=("num_images", "num_bbox_reg_classes", "box_dim",
                     "images_per_block"))
def wsddn_forward(x, w_cls, b_cls, w_det, b_det, *,
                  num_images: int, num_bbox_reg_classes: int, box_dim: int,
                  images_per_block=None):
    """x: (N, ...) region features; all images contribute N // num_images proposals."""
    if x.ndim > 2:
        x = x.reshape(x.shape[0], -1)          # torch.flatten(x, start_dim=1)
    N, D = x.shape
    assert N % num_images == 0, "kernel assumes equal proposals per image"
    R = N // num_images
    K = w_cls.shape[1]
    Kp = pl.cdiv(K, 128) * 128                 # lane-dense per-head width
    delta_dim = num_bbox_reg_classes * box_dim

    # --- Ragged-R handling: pad proposal rows to a sublane multiple ----------
    Rp = pl.cdiv(R, 8) * 8
    if Rp != R:
        # Only copies x in the ragged case; padded rows are masked in-kernel.
        x_in = jnp.pad(x.reshape(num_images, R, D),
                       ((0, 0), (0, Rp - R), (0, 0))
                       ).reshape(num_images * Rp, D)
    else:
        x_in = x
    rows_total = num_images * Rp

    # --- Fuse + pad the two heads in the wrapper (tiny (D, 2K) work) ---------
    f32 = jnp.float32
    w_cls_p = jnp.pad(w_cls.astype(f32), ((0, 0), (0, Kp - K)))
    w_det_p = jnp.pad(w_det.astype(f32), ((0, 0), (0, Kp - K)))
    w_fused = jnp.concatenate([w_cls_p, w_det_p], axis=1).astype(jnp.bfloat16)
    b_cls_p = jnp.concatenate(
        [b_cls.astype(f32), jnp.full((Kp - K,), _NEG_INF, dtype=f32)])
    b_det_p = jnp.pad(b_det.astype(f32), (0, Kp - K))
    b_fused = jnp.concatenate([b_cls_p, b_det_p]).reshape(1, 2 * Kp)

    # --- Generation-aware grid / VMEM sizing ---------------------------------
    x_bytes = jnp.dtype(x_in.dtype).itemsize
    vmem_cap = _vmem_capacity_bytes()
    w_vmem = D * 2 * Kp * 2 + 2 * Kp * 4       # single-buffered fused W + b

    def footprint(g):
        rows_g = g * Rp
        io = 2 * rows_g * D * x_bytes + 2 * rows_g * Kp * 4  # dbl-buffered x/out
        temps = 5 * rows_g * 2 * Kp * 4                      # f32 logits/exp/prob
        return w_vmem + io + temps

    if images_per_block is None:
        G = _pick_images_per_block(num_images, footprint,
                                   budget_bytes=vmem_cap // 2)
    else:
        G = int(images_per_block)
    assert num_images % G == 0
    rows = G * Rp
    grid = (num_images // G,)

    vmem_limit = int(min(max(footprint(G) + (4 << 20), 32 << 20),
                         (vmem_cap * 3) // 4))

    kernel = functools.partial(_wsddn_kernel, images_per_block=G,
                               rows_per_image=Rp, valid_rows=R, kp=Kp)

    grid_spec = pltpu.PrefetchScalarGridSpec(
        num_scalar_prefetch=0,
        grid=grid,
        in_specs=[
            # Feature slab streamed at its native dtype (no wrapper cast).
            pl.BlockSpec((rows, D), lambda i: (i, 0)),
            # Constant fused weight / bias: single-buffered, never re-fetched.
            pl.BlockSpec((D, 2 * Kp), lambda i: (0, 0),
                         pipeline_mode=pl.Buffered(1)),
            pl.BlockSpec((1, 2 * Kp), lambda i: (0, 0),
                         pipeline_mode=pl.Buffered(1)),
        ],
        out_specs=pl.BlockSpec((rows, Kp), lambda i: (i, 0)),  # lane-dense out
    )

    cost = pl.CostEstimate(
        flops=2 * rows_total * D * 2 * Kp,
        transcendentals=rows_total * 2 * Kp,
        bytes_accessed=(rows_total * D * x_bytes + rows_total * Kp * 4
                        + D * 2 * Kp * 2 + 2 * Kp * 4),
    )

    scores_padded = pl.pallas_call(
        kernel,
        grid_spec=grid_spec,
        out_shape=jax.ShapeDtypeStruct((rows_total, Kp), jnp.float32),
        compiler_params=pltpu.CompilerParams(
            dimension_semantics=("parallel",),   # image groups are independent
            vmem_limit_bytes=vmem_limit,
        ),
        cost_estimate=cost,
    )(x_in, w_fused, b_fused)

    if Rp != R:
        scores = scores_padded.reshape(num_images, Rp, Kp)[:, :R, :K] \
                              .reshape(N, K)
    else:
        scores = scores_padded[:, :K]
    # WSDDN does no box regression: synthesize the constant zeros outside the
    # kernel instead of streaming them through VMEM/HBM.
    proposal_deltas = jnp.zeros((N, delta_dim), dtype=scores.dtype)
    return scores, proposal_deltas


# ----------------------------- references ------------------------------------
def _reference_forward_f32(x, w_cls, b_cls, w_det, b_det, num_images):
    """Pure-JAX f32 reference matching the PyTorch forward."""
    if x.ndim > 2:
        x = x.reshape(x.shape[0], -1)
    N = x.shape[0]
    R = N // num_images
    outs = []
    for i in range(num_images):
        xi = x[i * R:(i + 1) * R]
        cls = jax.nn.softmax(xi @ w_cls + b_cls, axis=1)
        det = jax.nn.softmax(xi @ w_det + b_det, axis=0)
        outs.append(cls * det)
    return jnp.concatenate(outs, axis=0)


def _reference_forward_bf16(x, w_cls, b_cls, w_det, b_det, num_images):
    """Reference matching the kernel's precision (bf16 matmul, f32 acc/softmax)."""
    if x.ndim > 2:
        x = x.reshape(x.shape[0], -1)
    xb = x.astype(jnp.bfloat16)
    wcb = w_cls.astype(jnp.bfloat16)
    wdb = w_det.astype(jnp.bfloat16)
    N = x.shape[0]
    R = N // num_images
    outs = []
    for i in range(num_images):
        xi = xb[i * R:(i + 1) * R]
        cls_logits = jnp.dot(xi, wcb, preferred_element_type=jnp.float32) + b_cls
        det_logits = jnp.dot(xi, wdb, preferred_element_type=jnp.float32) + b_det
        cls = jax.nn.softmax(cls_logits, axis=1)
        det = jax.nn.softmax(det_logits, axis=0)
        outs.append(cls * det)
    return jnp.concatenate(outs, axis=0)


if __name__ == "__main__":
    # Small, module-consistent shapes:
    #   4 images x 8 proposals, ROI feature (C=4, H=4, W=4) -> input_size D = 64
    #   num_classes K = 16, box_dim = 4, class-specific regression -> deltas 64
    num_images = 4
    R = 8
    C, H, W = 4, 4, 4
    D = C * H * W
    K = 16
    box_dim = 4
    num_bbox_reg_classes = K          # cls_agnostic_bbox_reg = False
    N = num_images * R

    key = jax.random.PRNGKey(0)
    kx, kwc, kwd = jax.random.split(key, 3)

    # Region features, NCHW-style per-proposal features.
    x = jax.random.normal(kx, (N, C, H, W), dtype=jnp.float32)

    # Deterministic xavier_uniform-like init, biases = 0 (as in the module).
    bound = (6.0 / (D + K)) ** 0.5
    w_cls = jax.random.uniform(kwc, (D, K), minval=-bound, maxval=bound,
                               dtype=jnp.float32)
    w_det = jax.random.uniform(kwd, (D, K), minval=-bound, maxval=bound,
                               dtype=jnp.float32)
    b_cls = jnp.zeros((K,), dtype=jnp.float32)
    b_det = jnp.zeros((K,), dtype=jnp.float32)

    scores, deltas = wsddn_forward(
        x, w_cls, b_cls, w_det, b_det,
        num_images=num_images,
        num_bbox_reg_classes=num_bbox_reg_classes,
        box_dim=box_dim,
    )
    jax.block_until_ready((scores, deltas))

    assert scores.shape == (N, K)
    assert deltas.shape == (N, num_bbox_reg_classes * box_dim)
    assert bool(jnp.all(deltas == 0.0))

    # Tight check against a precision-matched (bf16 matmul, exact softmax) ref.
    ref_bf16 = _reference_forward_bf16(x, w_cls, b_cls, w_det, b_det, num_images)
    err_bf16 = float(jnp.max(jnp.abs(scores - ref_bf16)))
    assert jnp.allclose(scores, ref_bf16, atol=5e-3, rtol=2e-2), (
        f"mismatch vs bf16-matched reference, max abs err={err_bf16}")

    # Looser semantic check against the full-f32 module reference
    # (bf16 streaming + approx reciprocal introduce ~1e-3..1e-2 abs error).
    ref_f32 = _reference_forward_f32(x, w_cls, b_cls, w_det, b_det, num_images)
    err_f32 = float(jnp.max(jnp.abs(scores - ref_f32)))
    assert jnp.allclose(scores, ref_f32, atol=3e-2, rtol=3e-2), (
        f"mismatch vs f32 reference, max abs err={err_f32}")

    print("KERNEL_OK")
</pallas_src>

<mosaic_0001>
module attributes {stable_mosaic.version = 11 : i64} {
  func.func @_wsddn_kernel(%arg0: i32, %arg1: memref<8x64xf32, #tpu.memory_space<vmem>>, %arg2: memref<64x256xbf16, #tpu.memory_space<vmem>>, %arg3: memref<1x256xf32, #tpu.memory_space<vmem>>, %arg4: memref<8x128xf32, #tpu.memory_space<vmem>>) attributes {dimension_semantics = [#tpu.dimension_semantics<parallel>], iteration_bounds = array<i64: 4>, scalar_prefetch = 0 : i64, scratch_operands = 0 : i64, tpu.core_type = #tpu.core_type<tc>, window_params = [{transform_indices = @transform_0, window_bounds = array<i64: 8, 64>}, {pipeline_mode = #tpu.pipeline_mode<synchronous>, transform_indices = @transform_1, window_bounds = array<i64: 64, 256>}, {pipeline_mode = #tpu.pipeline_mode<synchronous>, transform_indices = @transform_2, window_bounds = array<i64: 1, 256>}, {transform_indices = @transform_3, window_bounds = array<i64: 8, 128>}]} {
    %c0 = arith.constant 0 : index
    %c0_0 = arith.constant 0 : index
    %0 = vector.load %arg1[%c0, %c0_0] : memref<8x64xf32, #tpu.memory_space<vmem>>, vector<8x64xf32>
    %1 = arith.truncf %0 : vector<8x64xf32> to vector<8x64xbf16>
    %c0_1 = arith.constant 0 : index
    %c0_2 = arith.constant 0 : index
    %2 = vector.load %arg2[%c0_1, %c0_2] : memref<64x256xbf16, #tpu.memory_space<vmem>>, vector<64x256xbf16>
    %cst = arith.constant dense<0.000000e+00> : vector<8x256xf32>
    %3 = tpu.matmul %1, %2, %cst {dimension_numbers = #tpu.dot_dimension_numbers<[1], [0], [0], [1], [0, 0, 1, 1], [], []>} : vector<8x64xbf16>, vector<64x256xbf16>, vector<8x256xf32> -> vector<8x256xf32>
    %c0_3 = arith.constant 0 : index
    %c0_4 = arith.constant 0 : index
    %4 = vector.load %arg3[%c0_3, %c0_4] : memref<1x256xf32, #tpu.memory_space<vmem>>, vector<1x256xf32>
    %5 = vector.broadcast %4 : vector<1x256xf32> to vector<8x256xf32>
    %6 = arith.addf %3, %5 : vector<8x256xf32>
    %7 = vector.shape_cast %6 : vector<8x256xf32> to vector<1x8x256xf32>
    %8 = vector.extract_strided_slice %7 {offsets = [0, 0, 0], sizes = [1, 8, 128], strides = [1, 1, 1]} : vector<1x8x256xf32> to vector<1x8x128xf32>
    %9 = vector.extract_strided_slice %7 {offsets = [0, 0, 128], sizes = [1, 8, 128], strides = [1, 1, 1]} : vector<1x8x256xf32> to vector<1x8x128xf32>
    %cst_5 = arith.constant dense<0xFF800000> : vector<1x8xf32>
    %10 = vector.multi_reduction <maximumf>, %8, %cst_5 [2] : vector<1x8x128xf32> to vector<1x8xf32>
    %11 = vector.shape_cast %10 : vector<1x8xf32> to vector<1x8x1xf32>
    %12 = vector.broadcast %11 : vector<1x8x1xf32> to vector<1x8x128xf32>
    %13 = arith.subf %8, %12 : vector<1x8x128xf32>
    %14 = math.exp %13 : vector<1x8x128xf32>
    %cst_6 = arith.constant dense<0.000000e+00> : vector<1x8xf32>
    %15 = vector.multi_reduction <add>, %14, %cst_6 [2] : vector<1x8x128xf32> to vector<1x8xf32>
    %16 = vector.shape_cast %15 : vector<1x8xf32> to vector<1x8x1xf32>
    %17 = tpu.reciprocal %16 {approx = true} : vector<1x8x1xf32> -> vector<1x8x1xf32>
    %18 = vector.broadcast %17 : vector<1x8x1xf32> to vector<1x8x128xf32>
    %19 = arith.mulf %14, %18 : vector<1x8x128xf32>
    %cst_7 = arith.constant dense<0xFF800000> : vector<1x128xf32>
    %20 = vector.multi_reduction <maximumf>, %9, %cst_7 [1] : vector<1x8x128xf32> to vector<1x128xf32>
    %21 = vector.shape_cast %20 : vector<1x128xf32> to vector<1x1x128xf32>
    %22 = vector.broadcast %21 : vector<1x1x128xf32> to vector<1x8x128xf32>
    %23 = arith.subf %9, %22 : vector<1x8x128xf32>
    %24 = math.exp %23 : vector<1x8x128xf32>
    %cst_8 = arith.constant dense<0.000000e+00> : vector<1x128xf32>
    %25 = vector.multi_reduction <add>, %24, %cst_8 [1] : vector<1x8x128xf32> to vector<1x128xf32>
    %26 = vector.shape_cast %25 : vector<1x128xf32> to vector<1x1x128xf32>
    %27 = tpu.reciprocal %26 {approx = true} : vector<1x1x128xf32> -> vector<1x1x128xf32>
    %28 = vector.broadcast %27 : vector<1x1x128xf32> to vector<1x8x128xf32>
    %29 = arith.mulf %24, %28 : vector<1x8x128xf32>
    %30 = arith.mulf %19, %29 : vector<1x8x128xf32>
    %31 = vector.shape_cast %30 : vector<1x8x128xf32> to vector<8x128xf32>
    %c0_9 = arith.constant 0 : index
    %c0_10 = arith.constant 0 : index
    %32 = vector.load %arg4[%c0_9, %c0_10] : memref<8x128xf32, #tpu.memory_space<vmem>>, vector<8x128xf32>
    tpu.vector_store %arg4[%c0_9, %c0_10], %31 {strides = array<i32>} : memref<8x128xf32, #tpu.memory_space<vmem>>, vector<8x128xf32>,
    return
  }
  func.func @transform_0(%arg0: i32) -> (i32, i32) {
    %c0_i32 = arith.constant 0 : i32
    %c0_i32_0 = arith.constant 0 : i32
    return %arg0, %c0_i32 : i32, i32
  }
  func.func @transform_1(%arg0: i32) -> (i32, i32) {
    %c0_i32 = arith.constant 0 : i32
    %c0_i32_0 = arith.constant 0 : i32
    %c0_i32_1 = arith.constant 0 : i32
    return %c0_i32, %c0_i32_0 : i32, i32
  }
  func.func @transform_2(%arg0: i32) -> (i32, i32) {
    %c0_i32 = arith.constant 0 : i32
    %c0_i32_0 = arith.constant 0 : i32
    %c0_i32_1 = arith.constant 0 : i32
    return %c0_i32, %c0_i32_0 : i32, i32
  }
  func.func @transform_3(%arg0: i32) -> (i32, i32) {
    %c0_i32 = arith.constant 0 : i32
    %c0_i32_0 = arith.constant 0 : i32
    return %arg0, %c0_i32 : i32, i32
  }
}

</mosaic_0001>

<bundles_post_ra>
// kernel: wsddn_forward.1
= control target key start
LH: loop header
LB: loop body
LE: loop exit
PB: predicated region body
PF: predicated region fallthrough
CT: control target
= control target key end

     0   :  { %s431_s12 = smov 0   ;;  %s482_s0 = inlined_call_operand.vmem [shape: f32[32,64], index: 0, kind: input, shape index: {}]   ;;  %s483_s1 = inlined_call_operand.vmem [shape: bf16[64,256], index: 1, kind: input, shape index: {}]   ;;  %s484_s2 = inlined_call_operand.vmem [shape: f32[1,256], index: 2, kind: input, shape index: {}]   ;;  %s485_s3 = inlined_call_operand.vmem [shape: f32[32,128], index: 3, kind: output, shape index: {}]  }
   0x1 LB: > { %s355_s13 = sadd.s32 4294967295, %s408_s12   ;;  %p359_p0 = scmp.ge.s32.totalorder %s408_s12, 1  ;;  %s408_s12 = sphi %s431_s12, %s13_s12  }
   0x2   : > { %p136_p1 = scmp.lt.s32.totalorder %s408_s12, 5 }
   0x4   : > { %p137_p2 = pnand %p359_p0, %p136_p1 }
   0x5   : > { %v382_v0 = vld [vmem:[%s483_s1 + $0x4] ss:$8 sps:$4 sm:$0xff] (!%p137_p2)   ;;  %p158_p3 = scmp.lt.s32.totalorder (!%p137_p2), %s355_s13, 3  ;;  %v384_v1 = vld [vmem:[%s483_s1] ss:$8 sps:$4 sm:$0xff] (!%p137_p2)   ;;  %v410_v2 = vmov (!%p137_p2), 0   ;;  %v179_v11 = vlaneseq (!%p137_p2) }
   0x6   : > { %140 = sbr.rel (%p137_p2) target bundleno = 551 (0x227), region = 32  ;;  %265 = vmatprep.mubr.bf16.mxu0 (!%p137_p2), %v410_v2  ;;  %233 = vmatprep.subr.bf16.mxu0 (!%p137_p2), %v382_v0  ;;  %v385_v3 = vld [vmem:[%s483_s1 + $0x14] ss:$8 sps:$4 sm:$0xff] (!%p137_p2)   ;;  %v387_v4 = vld [vmem:[%s483_s1 + $0x10] ss:$8 sps:$4 sm:$0xff] (!%p137_p2)   ;;  %vm229_vm0 = vcmask (!%p137_p2), 523264  }
   0x7   : > { %234 = vmatpush1.bf16.msra.mxu0 (!%p137_p2), %v384_v1  ;;  %v388_v5 = vld [vmem:[%s483_s1 + $0x24] ss:$8 sps:$4 sm:$0xff] (!%p137_p2)   ;;  %v390_v6 = vld [vmem:[%s483_s1 + $0x20] ss:$8 sps:$4 sm:$0xff] (!%p137_p2)   ;;  %v391_v7 = vld [vmem:[%s483_s1 + $0x34] ss:$8 sps:$4 sm:$0xff] (!%p137_p2)  }
   0x8   : > { %235 = vmatprep.subr.bf16.mxu0 (!%p137_p2), %v385_v3  ;;  %v393_v8 = vld [vmem:[%s483_s1 + $0x30] ss:$8 sps:$4 sm:$0xff] (!%p137_p2)   ;;  %v180_v12 = vshrl.u32 (!%p137_p2), %v179_v11, 7  ;;  %v177_v14 = vld [vmem:[%s484_s2] sm:$0x3] (!%p137_p2) }
   0xa   : > { %v181_v13 = vsub.s32 (!%p137_p2), 0, %v180_v12  ;;  %v185_v25 = vsub.s32 (!%p137_p2), 1, %v180_v12 }
   0xb   : > { %236 = vmatpush1.bf16.msra.mxu0 (!%p137_p2), %v387_v4 }
   0xc   : > { %237 = vmatprep.subr.bf16.mxu0 (!%p137_p2), %v388_v5  ;;  %v182_v15 = vrot.slane (!%p137_p2), %v177_v14, %v181_v13  ;;  %v186_v26 = vrot.slane (!%p137_p2), %v177_v14, %v185_v25 }
   0xd   : > { %s487_s13 = smov (!%p158_p3, %s355_s13), 3 }
   0xe   : > { %s360_s24 = sshll.u32 %s487_s13, 3 }
   0xf   : > { %s161_s4 = scalar_lea.vmem %s482_s0, %s360_s24  ;;  %238 = vmatpush1.bf16.msra.mxu0 %v390_v6  ;;  %s165_s11 = scalar_lea.vmem %s485_s3, %s360_s24 }
  0x10   : > { %v167_v9 = vld [vmem:[%s161_s4] sm:$0xff]  ;;  %239 = vmatprep.subr.bf16.mxu0 %v391_v7 }
  0x11   : > { %v168_v10 = vpack.c.bf16 %v167_v9, %v167_v9 }
  0x13   : > { %240 = vmatpush1.bf16.msra.mxu0 %v393_v8 }
  0x16   : > { %370 = vmatmul.mubr.msk.bf16.vlgmr.msra.gmra.mrb[0].mxu0 %vm229_vm0, %v168_v10 }
  0xe9   : > { %v267_v16 = vpop.f32.mrb[0].mxu0 }
  0xea   : > { %v268_v17 = vadd.f32 %v267_v16, %v182_v15  ;;  %v269_v18 = vpop.f32.mrb[1].mxu0 }
  0xeb   : > { %v271_v19 = vpop.f32.mrb[2].mxu0  ;;  %v270_v27 = vadd.f32 %v269_v18, %v186_v26 }
  0xec   : > { %v272_v20 = vpop.f32.mrb[3].mxu0  ;;  %274 = vmax.xlane.f32.xlu0 %v268_v17 }
  0xed   : > { %v283_v28 = vrot.slane %v270_v27, 4 }
  0xef   : > { %v284_v29 = vmax.f32 %v270_v27, %v283_v28 }
  0xf1   : > { %v285_v30 = vrot.slane %v284_v29, 2 }
  0xf3   : > { %v286_v31 = vmax.f32 %v284_v29, %v285_v30 }
  0xf5   : > { %v287_v32 = vrot.slane %v286_v31, 1 }
  0xf7   : > { %v288_v33 = vmax.f32 %v286_v31, %v287_v32 }
  0xf9   : > { %v289_v34 = vsub.f32 %v270_v27, %v288_v33 }
  0xfb   : > { %v290_v35 = vmul.f32 1.442695, %v289_v34 }
 0x179   : > { %v275_v21 = vpop.xlane.xlu0 %274 }
 0x17a   : > { %v276_v22 = vsub.f32 %v268_v17, %v275_v21 }
 0x17c   : > { %v277_v23 = vmul.f32 1.442695, %v276_v22 }
 0x17e   : > { %394 = vpow2.f32 %v277_v23 }
 0x17f   : > { %396 = vpow2.f32 %v290_v35 }
 0x188   : > { %v395_v24 = vpop.eup %394 }
 0x189   : > { %279 = vadd.xlane.f32.xlu0 %v395_v24  ;;  %v397_v36 = vpop.eup %396 }
 0x18a   : > { %v292_v37 = vrot.slane %v397_v36, 4 }
 0x18c   : > { %v293_v38 = vadd.f32 %v397_v36, %v292_v37 }
 0x18e   : > { %v294_v39 = vrot.slane %v293_v38, 2 }
 0x190   : > { %v295_v40 = vadd.f32 %v294_v39, %v293_v38 }
 0x192   : > { %v296_v41 = vrot.slane %v295_v40, 1 }
 0x194   : > { %v297_v42 = vadd.f32 %v296_v41, %v295_v40 }
 0x196   : > { %398 = vrcp.f32 %v297_v42 }
 0x1a0   : > { %v399_v44 = vpop.eup %398 }
 0x1a1   : > { %v299_v46 = vmul.f32 %v399_v44, %v397_v36 }
 0x216   : > { %v280_v43 = vpop.xlane.xlu0 %279 }
 0x217   : > { %400 = vrcp.f32 %v280_v43 }
 0x221   : > { %v401_v45 = vpop.eup %400 }
 0x222   : > { %v282_v47 = vmul.f32 %v401_v45, %v395_v24 }
 0x224   : > { %v300_v48 = vmul.f32 %v299_v46, %v282_v47 }
 0x226   : > { %301 = vst [vmem:[%s165_s11] sm:$0xff] %v300_v48 }
 0x227 PF: > { %s13_s12 = sadd.s32 1, %s408_s12  }
 0x228   : > { %p10_p4 = scmp.ge.s32.totalorder %s13_s12, 6  }
 0x22a   :  { %12 = sbr.rel (!%p10_p4) target bundleno = 1 (0x1), region = 62 }

</bundles_post_ra>
